<compile_context>
chip_gen: v7x
topology: tpu7x:2x2x1
jax: 0.10.0
libtpu: 0.0.40
codegen_flags: <defaults>
</compile_context>

<pallas_src>
import jax
import jax.numpy as jnp
import numpy as np
from jax.experimental import pallas as pl
from jax.experimental.pallas import tpu as pltpu

_LANE = 128


def _round_up(x, m):
    return ((x + m - 1) // m) * m


def _spatial_attention_kernel(b_ref, w_ref, x_ref, o_ref):
    # b_ref: (1,)          SMEM  conv bias (f32)
    # w_ref: (C, 1)        VMEM  1x1-conv weight for the single output channel (f32)
    # x_ref: (1, C, T_HW)  VMEM  input tile
    # o_ref: (1, C, T_HW)  VMEM  gated output tile
    x = x_ref[0]                                   # (C, T_HW), input dtype
    w = w_ref[...]                                 # (C, 1), f32
    b = b_ref[0]                                   # scalar f32

    # 1x1 conv with one output channel == channel reduction at every pixel.
    # VPU broadcast-multiply + XLU sublane reduce; logits accumulated in f32.
    logits = jnp.sum(w * x.astype(jnp.float32), axis=0, keepdims=True) + b  # (1, T_HW)
    att = jax.nn.sigmoid(logits)                                            # (1, T_HW) f32

    # Gate in the input dtype (no second full-tile f32 upcast for bf16 inputs).
    o_ref[0] = att.astype(x.dtype) * x


def spatial_attention(x, weight, bias, *, vmem_tile_budget_bytes=16 * 1024 * 1024):
    """x: (N, C, H, W) NCHW. weight: (1, C, 1, 1). bias: (1,)."""
    N, C, H, W = x.shape
    HW = H * W

    itemsize = jnp.dtype(x.dtype).itemsize
    # Budget covers double-buffered input + output tiles of shape (C, T_HW).
    t_hw = vmem_tile_budget_bytes // (4 * C * itemsize)
    t_hw = max(_LANE, (t_hw // _LANE) * _LANE)          # lane-dense multiple of 128
    t_hw = min(t_hw, 8192, _round_up(HW, _LANE))        # cap tile, never exceed padded HW
    hw_padded = _round_up(_round_up(HW, _LANE), t_hw)   # pad so tiles divide evenly

    xf = x.reshape(N, C, HW)
    if hw_padded != HW:
        xf = jnp.pad(xf, ((0, 0), (0, 0), (0, hw_padded - HW)))

    w2 = weight.reshape(C, 1).astype(jnp.float32)
    b1 = bias.reshape(1).astype(jnp.float32)

    grid = (N, hw_padded // t_hw)

    out = pl.pallas_call(
        _spatial_attention_kernel,
        out_shape=jax.ShapeDtypeStruct((N, C, hw_padded), x.dtype),
        grid_spec=pltpu.PrefetchScalarGridSpec(
            num_scalar_prefetch=0,
            grid=grid,
            in_specs=[
                pl.BlockSpec(memory_space=pltpu.MemorySpace.SMEM),      # bias scalar
                pl.BlockSpec((C, 1), lambda n, j: (0, 0)),              # weight (replicated)
                pl.BlockSpec((1, C, t_hw), lambda n, j: (n, 0, j)),     # x tile
            ],
            out_specs=pl.BlockSpec((1, C, t_hw), lambda n, j: (n, 0, j)),
        ),
        compiler_params=pltpu.CompilerParams(
            dimension_semantics=("parallel", "parallel"),
            vmem_limit_bytes=32 * 1024 * 1024,
        ),
    )(b1, w2, xf)

    if hw_padded != HW:
        out = out[:, :, :HW]
    return out.reshape(N, C, H, W)


def _reference(x, weight, bias):
    # Pure-JAX reference of the PyTorch forward for verification.
    w = weight.reshape(1, -1).astype(jnp.float32)             # (1, C)
    logits = jnp.einsum("oc,nchw->nohw", w, x.astype(jnp.float32)) + bias.reshape(1, 1, 1, 1)
    att = jax.nn.sigmoid(logits)                              # (N, 1, H, W)
    return (att * x.astype(jnp.float32)).astype(x.dtype)


if __name__ == "__main__":
    key = jax.random.PRNGKey(0)
    k_x, k_w, k_b = jax.random.split(key, 3)

    N, C, H, W = 2, 4, 16, 16
    x = jax.random.normal(k_x, (N, C, H, W), dtype=jnp.float32)

    # Deterministic "conv" parameters matching nn.Conv2d(C, 1, kernel_size=1).
    weight = jax.random.normal(k_w, (1, C, 1, 1), dtype=jnp.float32) * 0.1
    bias = jax.random.normal(k_b, (1,), dtype=jnp.float32) * 0.1

    out = spatial_attention(x, weight, bias)
    out = jax.block_until_ready(out)

    ref = _reference(x, weight, bias)
    np.testing.assert_allclose(np.asarray(out), np.asarray(ref), rtol=1e-5, atol=1e-5)

    print("KERNEL_OK")
</pallas_src>

<mosaic_0001>
module attributes {stable_mosaic.version = 11 : i64} {
  func.func @_spatial_attention_kernel(%arg0: i32, %arg1: i32, %arg2: memref<1xf32, #tpu.memory_space<smem>>, %arg3: memref<4x1xf32, #tpu.memory_space<vmem>>, %arg4: memref<1x4x256xf32, #tpu.memory_space<vmem>>, %arg5: memref<1x4x256xf32, #tpu.memory_space<vmem>>) attributes {dimension_semantics = [#tpu.dimension_semantics<parallel>, #tpu.dimension_semantics<parallel>], iteration_bounds = array<i64: 2, 1>, scalar_prefetch = 0 : i64, scratch_operands = 0 : i64, tpu.core_type = #tpu.core_type<tc>, window_params = [{transform_indices = @transform_0, window_bounds = array<i64: 1>}, {pipeline_mode = #tpu.pipeline_mode<synchronous>, transform_indices = @transform_1, window_bounds = array<i64: 4, 1>}, {transform_indices = @transform_2, window_bounds = array<i64: 1, 4, 256>}, {transform_indices = @transform_3, window_bounds = array<i64: 1, 4, 256>}]} {
    %c0 = arith.constant 0 : index
    %c0_0 = arith.constant 0 : index
    %c0_1 = arith.constant 0 : index
    %0 = vector.load %arg4[%c0, %c0_0, %c0_1] : memref<1x4x256xf32, #tpu.memory_space<vmem>>, vector<1x4x256xf32>
    %1 = vector.shape_cast %0 : vector<1x4x256xf32> to vector<4x256xf32>
    %c0_2 = arith.constant 0 : index
    %c0_3 = arith.constant 0 : index
    %2 = vector.load %arg3[%c0_2, %c0_3] : memref<4x1xf32, #tpu.memory_space<vmem>>, vector<4x1xf32>
    %c0_4 = arith.constant 0 : index
    %3 = memref.load %arg2[%c0_4] : memref<1xf32, #tpu.memory_space<smem>>
    %4 = vector.broadcast %2 : vector<4x1xf32> to vector<4x256xf32>
    %5 = arith.mulf %4, %1 : vector<4x256xf32>
    %cst = arith.constant dense<0.000000e+00> : vector<256xf32>
    %6 = vector.multi_reduction <add>, %5, %cst [0] : vector<4x256xf32> to vector<256xf32>
    %7 = vector.shape_cast %6 : vector<256xf32> to vector<1x256xf32>
    %8 = vector.broadcast %3 : f32 to vector<1x256xf32>
    %9 = arith.addf %7, %8 : vector<1x256xf32>
    %10 = arith.negf %9 : vector<1x256xf32>
    %11 = math.exp %10 : vector<1x256xf32>
    %cst_5 = arith.constant 1.000000e+00 : f32
    %12 = vector.broadcast %cst_5 : f32 to vector<1x256xf32>
    %13 = arith.addf %12, %11 : vector<1x256xf32>
    %14 = arith.divf %12, %13 : vector<1x256xf32>
    %15 = vector.broadcast %14 : vector<1x256xf32> to vector<4x256xf32>
    %16 = arith.mulf %15, %1 : vector<4x256xf32>
    %c0_6 = arith.constant 0 : index
    %c0_7 = arith.constant 0 : index
    %c0_8 = arith.constant 0 : index
    %17 = vector.load %arg5[%c0_6, %c0_7, %c0_8] : memref<1x4x256xf32, #tpu.memory_space<vmem>>, vector<1x4x256xf32>
    %18 = vector.shape_cast %17 : vector<1x4x256xf32> to vector<4x256xf32>
    %19 = vector.shape_cast %16 : vector<4x256xf32> to vector<1x4x256xf32>
    tpu.vector_store %arg5[%c0_6, %c0_7, %c0_8], %19 {strides = array<i32>} : memref<1x4x256xf32, #tpu.memory_space<vmem>>, vector<1x4x256xf32>,
    return
  }
  func.func @transform_0(%arg0: i32, %arg1: i32) -> i32 {
    %c0_i32 = arith.constant 0 : i32
    %c0_i32_0 = arith.constant 0 : i32
    return %c0_i32 : i32
  }
  func.func @transform_1(%arg0: i32, %arg1: i32) -> (i32, i32) {
    %c0_i32 = arith.constant 0 : i32
    %c0_i32_0 = arith.constant 0 : i32
    %c0_i32_1 = arith.constant 0 : i32
    return %c0_i32, %c0_i32_0 : i32, i32
  }
  func.func @transform_2(%arg0: i32, %arg1: i32) -> (i32, i32, i32) {
    %c0_i32 = arith.constant 0 : i32
    %c0_i32_0 = arith.constant 0 : i32
    return %arg0, %c0_i32, %arg1 : i32, i32, i32
  }
  func.func @transform_3(%arg0: i32, %arg1: i32) -> (i32, i32, i32) {
    %c0_i32 = arith.constant 0 : i32
    %c0_i32_0 = arith.constant 0 : i32
    return %arg0, %c0_i32, %arg1 : i32, i32, i32
  }
}

</mosaic_0001>

<bundles_post_ra>
// kernel: tpu_custom_call.1
= control target key start
LH: loop header
LB: loop body
LE: loop exit
PB: predicated region body
PF: predicated region fallthrough
CT: control target
= control target key end

     0   :  { %s770_s0 = inlined_call_operand.<no memory space> [shape: f32[1], index: 0, kind: input, shape index: {}]   ;;  %s771_s1 = inlined_call_operand.vmem [shape: f32[4,1], index: 1, kind: input, shape index: {}]   ;;  %s772_s2 = inlined_call_operand.hbm [shape: f32[2,4,256], index: 2, kind: input, shape index: {}]   ;;  %s773_s3 = inlined_call_operand.hbm [shape: f32[2,4,256], index: 3, kind: output, shape index: {}]  }
   0x1   :  { %8 = sst [smem:[#allocation2]] %s770_s0 }
   0x2   :  { %9 = vsyncpa [#allocation4], 0 }
   0x3   :  { %11 = vsyncpa [#allocation4 + $0x1], 0 }
   0x4   :  { %12 = vsyncpa [#allocation5], 0 }
   0x5   :  { %14 = vsyncpa [#allocation5 + $0x1], 0  ;;  %s591_s14 = smov 0   ;;  %s593_s15 = smov 0  }
   0x6   :  { %s595_s16 = smov 0   ;;  %s597_s17 = smov 0  }
   0x7   :  { %s599_s18 = smov 0   ;;  %s601_s19 = smov 0  }
   0x8 LB: > { %s359_s0 = sadd.s32 4294967295, %s563_s19   ;;  %s360_s20 = sadd.s32 4294967294, %s563_s19   ;;  %s563_s19 = sphi %s601_s19, %s20_s19   ;;  %s559_s18 = sphi %s599_s18, %s789_s18   ;;  %s555_s17 = sphi %s597_s17, %s788_s17   ;;  %s551_s16 = sphi %s595_s16, %s787_s16   ;;  %s547_s15 = sphi %s593_s15, %s786_s15   ;;  %s543_s14 = sphi %s591_s14, %s785_s14  }
   0x9   : > { %s32_s21 = sadd.s32 1, %s559_s18  ;;  %s83_s22 = sadd.s32 1, %s551_s16 }
   0xa   : > { %p34_p0 = scmp.ge.s32.totalorder %s32_s21, 2  ;;  %p90_p1 = scmp.ne.s32.totalorder %s551_s16, %s547_s15 }
   0xb   : > { %p91_p2 = scmp.eq.s32.totalorder %s563_s19, 0  ;;  %p96_p3 = scmp.ne.s32.totalorder %s547_s15, %s543_s14 }
   0xc   : > { %s791_s21 = smov (%p34_p0, %s32_s21), 0  ;;  %p97_p5 = scmp.eq.s32.totalorder %s359_s0, 0 }
   0xd   : > { %p632_p4 = por %p91_p2, %p90_p1  ;;  %s78_s24 = ssub.s32 %s559_s18, %s791_s21 }
   0xe   : > { %p122_p6 = scmp.eq.s32.totalorder %s359_s0, 1  ;;  %p81_p7 = scmp.eq.s32.totalorder %s78_s24, 0 }
   0xf   : > { %p638_p8 = por %p97_p5, %p96_p3  ;;  %p128_p10 = scmp.eq.s32.totalorder %s360_s20, 1 }
  0x10   : > { %p642_p9 = por %p122_p6, %p90_p1  ;;  %p390_p13 = scmp.lt.s32.totalorder %s563_s19, 2 }
  0x11   : > { %s647_s27 = scalar_select %p81_p7, %s551_s16, %s83_s22  }
  0x12   : > { %s777_s26 = scalar_select %p642_p9, 1, 0 }
  0x13   : > { %p649_p11 = por %p128_p10, %p96_p3  ;;  %s154_s29 = sand.u32 1, %s551_s16  }
  0x14   : > { %s363_s30 = sshll.u32 %s154_s29, 3  ;;  %s376_s4 = sshll.u32 %s559_s18, 7 }
  0x15   : > { %s778_s28 = scalar_select %p649_p11, 1, 0 }
  0x16   : > { %s660_s7 = scalar_lea.hbm %s772_s2, %s376_s4  ;;  %s158_s8 = scalar_lea.vmem [#allocation3], %s363_s30 }
  0x17   : > { %s168_s9 = sshll.u32 %s158_s8, 4  ;;  %p666_p0 = pnand %p390_p13, %p632_p4  ;;  %s662_s9 = int_to_ptr.vmem [resolvable:$true] %s168_s9 }
  0x18   : > { %s155_s11 = scalar_lea.sflag [#allocation4], %s154_s29  ;;  %s451_s12 = scalar_lea.hbm %s660_s7, 128 }
  0x19   : > { %p452_p3 = scmp.ne.s32.totalorder %s660_s7, %s451_s12  ;;  %p453_p5 = pneg %p666_p0 }
  0x1a   : > { %s456_s20 = scalar_lea.hbm %s772_s2, 256  ;;  %p457_p4 = scmp.lt.u32.totalorder %s660_s7, %s772_s2 }
  0x1b   : > { %p454_p6 = pnand %p453_p5, %p452_p3  ;;  %p458_p10 = scmp.lt.u32.totalorder %s456_s20, %s451_s12 }
  0x1c   : > { %p460_p12 = scmp.lt.u32.totalorder %s451_s12, %s660_s7 }
  0x1d   : > { %p455_p7 = pneg %p454_p6  ;;  %p459_p13 = por %p458_p10, %p457_p4 }
  0x1f   : > { %p461_p1 = por %p460_p12, %p459_p13 }
  0x21   : > { %p462_p2 = pnand %p461_p1, %p455_p7 }
  0x23   : > { %465 = shalt.err (!%p462_p2)
}
  0x24   : > { %s466_s24 = scalar_lea.vmem %s662_s9, 128  ;;  %s565_s29 = smov [#allocation3]  }
  0x25   : > { %p467_p3 = scmp.ne.s32.totalorder %s662_s9, %s466_s24  ;;  %s471_s30 = sshll.u32 %s565_s29, 4  ;;  %s472_s30 = int_to_ptr.vmem [resolvable:$false] %s471_s30 }
  0x26   : > { %s473_s4 = scalar_lea.vmem %s472_s30, 256  ;;  %p474_p9 = scmp.lt.s32.totalorder %s662_s9, %s472_s30 }
  0x27   : > { %p469_p6 = pnand %p467_p3, %p453_p5  ;;  %p475_p4 = scmp.lt.s32.totalorder %s473_s4, %s466_s24 }
  0x29   : > { %p470_p11 = pneg %p469_p6  ;;  %p476_p10 = por %p475_p4, %p474_p9 }
  0x2b   : > { %p477_p12 = pnand %p476_p10, %p470_p11 }
  0x2d   : > { %480 = shalt.err (!%p477_p12)
}
  0x2e   : > { %385 = dma.hbm_to_vmem [thread:$0]  (!%p666_p0), %s660_s7, 128, %s662_s9, %s155_s11  }
  0x2f   : > { %p780_p1 = scmp.lt.s32.totalorder %s563_s19, 3  ;;  %p781_p2 = scmp.ge.s32.totalorder %s563_s19, 1 }
  0x31   : > { %p174_p5 = pnand %p781_p2, %p780_p1 }
  0x32   : > { %s702_s5 = sand.u32 (!%p174_p5), 1, %s547_s15  }
  0x33   : > { %177 = sbr.rel (%p174_p5) target bundleno = 251 (0xfb), region = 32  ;;  %s367_s6 = sshll.u32 (!%p174_p5), %s702_s5, 3 }
  0x34   : > { %s180_s8 = scalar_lea.sflag (!%p174_p5), [#allocation4], %s702_s5  ;;  %s183_s10 = scalar_lea.vmem (!%p174_p5), [#allocation3], %s367_s6 }
  0x3a   : > { %534 = dma.done.wait (%p638_p8), %s180_s8, 128  }
  0x3b   : > { %536 = vsyncadd (%p638_p8), %s180_s8, 4294967168  ;;  %v566_v0 = vmov 0   ;;  %v209_v1 = vld [vmem:[%s771_s1] sm:$0xf]  ;;  %vm221_vm0 = vcmask 1043456   ;;  %s210_s11 = sld [smem:[#allocation2]] }
  0x3c   : > { %441 = vset.pattern.permute.xlu0 %v566_v0  ;;  %v208_v2 = vld [vmem:[%s183_s10] sm:$0xff]  ;;  %s377_s25 = sshll.u32 %s555_s17, 7  ;;  %s205_s12 = scalar_lea.vmem [#allocation6], %s367_s6 }
  0x3d   : > { %213 = vperm.xlu0 %441, %v209_v1   ;;  %v217_v3 = vcombine.high %v208_v2, %v208_v2  ;;  %s275_s13 = sshll.u32 %s205_s12, 4  ;;  %s721_s22 = scalar_lea.hbm %s773_s3, %s377_s25  ;;  %s723_s13 = int_to_ptr.vmem [resolvable:$true] %s275_s13 }
  0x3e   : > { %s259_s23 = scalar_lea.sflag [#allocation5], %s702_s5  ;;  %s481_s24 = scalar_lea.vmem %s723_s13, 128 }
  0x3f   : > { %p482_p8 = scmp.ne.s32.totalorder %s723_s13, %s481_s24  ;;  %p782_p9 = scmp.ne.s32.totalorder %s777_s26, 0 }
  0x40   : > { %s567_s17 = smov [#allocation6]  }
  0x41   : > { %v236_v19 = vstv %s210_s11  ;;  %p483_p11 = pnand %p482_p8, %p782_p9  ;;  %s485_s29 = sshll.u32 %s567_s17, 4  ;;  %s486_s29 = int_to_ptr.vmem [resolvable:$false] %s485_s29 }
  0x42   : > { %s487_s30 = scalar_lea.vmem %s486_s29, 256  ;;  %p488_p7 = scmp.lt.s32.totalorder %s723_s13, %s486_s29 }
  0x43   : > { %p484_p0 = pneg %p483_p11  ;;  %p489_p13 = scmp.lt.s32.totalorder %s487_s30, %s481_s24 }
  0x45   : > { %p490_p3 = por %p489_p13, %p488_p7 }
  0x47   : > { %p491_p6 = pnand %p490_p3, %p484_p0 }
  0xbc   : > { %v214_v4 = vpop.permute.xlu0 %213 }
  0xbd   : > { %v219_v5 = vmul.f32 %v214_v4, %v208_v2  ;;  %v220_v6 = vmul.f32 %v217_v3, %v214_v4 }
  0xbf   : > { %v222_v7 = vsel %vm221_vm0, %v219_v5, 0.0  ;;  %v229_v8 = vsel %vm221_vm0, %v220_v6, 0.0 }
  0xc0   : > { %v223_v9 = vrot.slane %v222_v7, 4  ;;  %v230_v10 = vrot.slane %v229_v8, 4 }
  0xc2   : > { %v224_v11 = vadd.f32 %v223_v9, %v222_v7  ;;  %v231_v12 = vadd.f32 %v230_v10, %v229_v8 }
  0xc4   : > { %v225_v13 = vrot.slane %v224_v11, 2  ;;  %v232_v14 = vrot.slane %v231_v12, 2 }
  0xc6   : > { %v226_v15 = vadd.f32 %v225_v13, %v224_v11  ;;  %v233_v16 = vadd.f32 %v232_v14, %v231_v12 }
  0xc8   : > { %v227_v17 = vrot.slane %v226_v15, 1  ;;  %v234_v18 = vrot.slane %v233_v16, 1 }
  0xca   : > { %v228_v20 = vadd.f32 %v227_v17, %v226_v15  ;;  %v235_v21 = vadd.f32 %v234_v18, %v233_v16 }
  0xcc   : > { %v237_v22 = vadd.f32 %v236_v19, %v228_v20  ;;  %v238_v23 = vadd.f32 %v236_v19, %v235_v21 }
  0xce   : > { %v369_v24 = vmul.f32 -1.442695, %v237_v22  ;;  %v370_v25 = vmul.f32 -1.442695, %v238_v23 }
  0xd0   : > { %443 = vpow2.f32 %v369_v24 }
  0xd1   : > { %445 = vpow2.f32 %v370_v25 }
  0xda   : > { %v444_v26 = vpop.eup %443 }
  0xdb   : > { %v446_v27 = vpop.eup %445  ;;  %v245_v28 = vadd.f32 1.0, %v444_v26 }
  0xdc   : > { %v246_v29 = vadd.f32 1.0, %v446_v27 }
  0xdd   : > { %447 = vrcp.f32 %v245_v28 }
  0xde   : > { %449 = vrcp.f32 %v246_v29 }
  0xe7   : > { %v448_v30 = vpop.eup %447 }
  0xe8   : > { %v450_v31 = vpop.eup %449  ;;  %v251_v32 = vmul.f32 %v448_v30, %v208_v2 }
  0xe9   : > { %v252_v33 = vmul.f32 %v450_v31, %v217_v3 }
  0xeb   : > { %v255_v34 = vcombine.low %v251_v32, %v252_v33 }
  0xed   : > { %257 = vst [vmem:[%s205_s12] sm:$0xff] %v255_v34 }
  0xee   : > { %494 = shalt.err (!%p491_p6)
}
  0xef   : > { %s495_s4 = scalar_lea.hbm %s721_s22, 128  ;;  %s499_s8 = scalar_lea.hbm %s773_s3, 256 }
  0xf0   : > { %p496_p4 = scmp.ne.s32.totalorder %s721_s22, %s495_s4  ;;  %p500_p1 = scmp.lt.u32.totalorder %s721_s22, %s773_s3 }
  0xf1   : > { %p501_p2 = scmp.lt.u32.totalorder %s499_s8, %s495_s4  ;;  %p503_p8 = scmp.lt.u32.totalorder %s495_s4, %s721_s22 }
  0xf2   : > { %p497_p10 = pnand %p496_p4, %p782_p9 }
  0xf3   : > { %p502_p5 = por %p501_p2, %p500_p1 }
  0xf4   : > { %p498_p12 = pneg %p497_p10 }
  0xf5   : > { %p504_p11 = por %p503_p8, %p502_p5 }
  0xf7   : > { %p505_p0 = pnand %p504_p11, %p498_p12 }
  0xf9   : > { %508 = shalt.err (!%p505_p0)
}
  0xfa   : > { %380 = dma.vmem_to_hbm [thread:$0]  (%p782_p9), %s723_s13, 128, %s721_s22, %s259_s23  }
  0xfb PF: > { %s287_s9 = sand.u32 1, %s543_s14   ;;  %p783_p7 = scmp.ne.s32.totalorder %s778_s28, 0 }
  0xfc   : > { %p784_p13 = scmp.ge.s32.totalorder %s563_s19, 2  ;;  %s288_s11 = scalar_lea.sflag [#allocation5], %s287_s9 }
  0xfe   : > { %p387_p3 = pnand %p784_p13, %p783_p7 }
 0x100   : > { %538 = dma.done.wait (!%p387_p3), %s288_s11, 128  }
 0x101   : > { %540 = vsyncadd (!%p387_p3), %s288_s11, 4294967168  ;;  %s20_s19 = sadd.s32 1, %s563_s19   ;;  %s785_s14 = smov %s547_s15 }
 0x102   : > { %p17_p6 = scmp.ge.s32.totalorder %s20_s19, 4   ;;  %s786_s15 = smov %s551_s16 }
 0x103   : > { %s787_s16 = smov %s647_s27  ;;  %s788_s17 = smov %s559_s18 }
 0x104   : > { %s789_s18 = smov %s791_s21  ;;  %19 = sbr.rel (!%p17_p6) target bundleno = 8 (0x8), region = 77 }
 0x10b   :  { %293 = vsyncpa [#allocation4], 1 }
 0x10c   :  { %295 = vsyncpa [#allocation4 + $0x1], 1 }
 0x10d   :  { %296 = vsyncpa [#allocation5], 1 }
 0x10e   :  { %298 = vsyncpa [#allocation5 + $0x1], 1 }

</bundles_post_ra>
